<compile_context>
chip_gen: v7x
topology: tpu7x:2x2x1
jax: 0.10.0
libtpu: 0.0.40
codegen_flags: <defaults>
</compile_context>

<pallas_src>
import jax
import jax.numpy as jnp
from jax.experimental import pallas as pl
from jax.experimental.pallas import tpu as pltpu


def add_pe_kernel(x_ref, pe_ref, o_ref):
    # x_ref: (b_blk, t_blk, D), pe_ref: (1, t_blk, D) -> broadcast over batch.
    o_ref[...] = x_ref[...] + pe_ref[...]


def flexible_positional_encoding_forward(x, pos_embed, *, b_blk=None, t_blk=None):
    """x: (B, T, D), pos_embed: (1, max_len, D) -> (B, T, D)."""
    B, T, D = x.shape
    max_len = pos_embed.shape[1]
    if T > max_len:
        raise ValueError('Increase max_len for positional encoding.')

    # F.interpolate(length T -> length T, linear, align_corners=False) is the
    # identity, so pe == pos_embed[:, :T].  (See ref_forward for the general
    # interpolation formula, which reduces to this.)
    pe = pos_embed[:, :T, :].astype(x.dtype)            # (1, T, D)

    # Block sizing: full D on lanes; t_blk either full T or a multiple of 8;
    # b_blk chosen so one x tile is ~<=2 MiB (plenty of VMEM headroom with
    # double buffering on every generation).
    if t_blk is None:
        t_blk = T if T <= 512 else 512                  # 512 % 8 == 0
    if b_blk is None:
        itemsize = jnp.dtype(x.dtype).itemsize
        tile_bytes = t_blk * D * itemsize
        b_blk = int(max(1, min(B, (2 * 1024 * 1024) // max(tile_bytes, 1))))

    grid = (pl.cdiv(T, t_blk), pl.cdiv(B, b_blk))       # batch axis innermost

    out = pl.pallas_call(
        add_pe_kernel,
        out_shape=jax.ShapeDtypeStruct((B, T, D), x.dtype),
        grid=grid,
        in_specs=[
            pl.BlockSpec((b_blk, t_blk, D), lambda t, b: (b, t, 0)),
            pl.BlockSpec((1, t_blk, D), lambda t, b: (0, t, 0)),
        ],
        out_specs=pl.BlockSpec((b_blk, t_blk, D), lambda t, b: (b, t, 0)),
        compiler_params=pltpu.CompilerParams(
            dimension_semantics=("parallel", "parallel")),
    )(x, pe)
    return out


# ------------------------- pure-JAX reference -------------------------

def ref_forward(x, pos_embed):
    """Follows F.interpolate(mode='linear', align_corners=False) exactly."""
    B, T, D = x.shape
    pe = pos_embed[:, :T, :]                            # (1, T, D)
    in_len, out_len = pe.shape[1], T
    scale = in_len / out_len
    i = jnp.arange(out_len, dtype=jnp.float32)
    src = jnp.maximum((i + 0.5) * scale - 0.5, 0.0)     # PyTorch clamps src >= 0
    lo = jnp.floor(src).astype(jnp.int32)
    hi = jnp.minimum(lo + 1, in_len - 1)
    w = (src - lo.astype(jnp.float32))[None, :, None]
    pe_i = pe[:, lo, :] * (1.0 - w) + pe[:, hi, :] * w  # identity when in==out
    return x + pe_i.astype(x.dtype)


if __name__ == "__main__":
    key = jax.random.PRNGKey(0)
    kx, kp = jax.random.split(key)

    B, T, D, max_len = 2, 16, 128, 256
    x = jax.random.normal(kx, (B, T, D), dtype=jnp.float32)
    pos_embed = jax.random.normal(kp, (1, max_len, D), dtype=jnp.float32)

    out = flexible_positional_encoding_forward(x, pos_embed)
    out = jax.block_until_ready(out)
    assert out.shape == (B, T, D)

    ref = ref_forward(x, pos_embed)
    err = float(jnp.max(jnp.abs(out - ref)))
    if not bool(jnp.all(jnp.isfinite(out))) or err > 1e-5:
        raise AssertionError(f"kernel output mismatch vs reference: max abs err {err}")

    print("KERNEL_OK")
</pallas_src>

<mosaic_0001>
module attributes {stable_mosaic.version = 11 : i64} {
  func.func @add_pe_kernel(%arg0: i32, %arg1: i32, %arg2: memref<2x16x128xf32, #tpu.memory_space<vmem>>, %arg3: memref<1x16x128xf32, #tpu.memory_space<vmem>>, %arg4: memref<2x16x128xf32, #tpu.memory_space<vmem>>) attributes {dimension_semantics = [#tpu.dimension_semantics<parallel>, #tpu.dimension_semantics<parallel>], iteration_bounds = array<i64: 1, 1>, scalar_prefetch = 0 : i64, scratch_operands = 0 : i64, tpu.core_type = #tpu.core_type<tc>, window_params = [{transform_indices = @transform_0, window_bounds = array<i64: 2, 16, 128>}, {transform_indices = @transform_1, window_bounds = array<i64: 1, 16, 128>}, {transform_indices = @transform_2, window_bounds = array<i64: 2, 16, 128>}]} {
    %c0 = arith.constant 0 : index
    %c0_0 = arith.constant 0 : index
    %c0_1 = arith.constant 0 : index
    %0 = vector.load %arg2[%c0, %c0_0, %c0_1] : memref<2x16x128xf32, #tpu.memory_space<vmem>>, vector<2x16x128xf32>
    %c0_2 = arith.constant 0 : index
    %c0_3 = arith.constant 0 : index
    %c0_4 = arith.constant 0 : index
    %1 = vector.load %arg3[%c0_2, %c0_3, %c0_4] : memref<1x16x128xf32, #tpu.memory_space<vmem>>, vector<1x16x128xf32>
    %2 = vector.broadcast %1 : vector<1x16x128xf32> to vector<2x16x128xf32>
    %3 = arith.addf %0, %2 : vector<2x16x128xf32>
    %c0_5 = arith.constant 0 : index
    %c0_6 = arith.constant 0 : index
    %c0_7 = arith.constant 0 : index
    %4 = vector.load %arg4[%c0_5, %c0_6, %c0_7] : memref<2x16x128xf32, #tpu.memory_space<vmem>>, vector<2x16x128xf32>
    tpu.vector_store %arg4[%c0_5, %c0_6, %c0_7], %3 {strides = array<i32>} : memref<2x16x128xf32, #tpu.memory_space<vmem>>, vector<2x16x128xf32>,
    return
  }
  func.func @transform_0(%arg0: i32, %arg1: i32) -> (i32, i32, i32) {
    %c0_i32 = arith.constant 0 : i32
    %c0_i32_0 = arith.constant 0 : i32
    return %arg1, %arg0, %c0_i32 : i32, i32, i32
  }
  func.func @transform_1(%arg0: i32, %arg1: i32) -> (i32, i32, i32) {
    %c0_i32 = arith.constant 0 : i32
    %c0_i32_0 = arith.constant 0 : i32
    %c0_i32_1 = arith.constant 0 : i32
    return %c0_i32, %arg0, %c0_i32_0 : i32, i32, i32
  }
  func.func @transform_2(%arg0: i32, %arg1: i32) -> (i32, i32, i32) {
    %c0_i32 = arith.constant 0 : i32
    %c0_i32_0 = arith.constant 0 : i32
    return %arg1, %arg0, %c0_i32 : i32, i32, i32
  }
}

</mosaic_0001>

<bundles_post_ra>
// kernel: tpu_custom_call.1
= control target key start
LH: loop header
LB: loop body
LE: loop exit
PB: predicated region body
PF: predicated region fallthrough
CT: control target
= control target key end

     0   :  { %7 = vsyncpa [#allocation3], 0  ;;  %s214_s0 = inlined_call_operand.hbm [shape: f32[2,16,128], index: 0, kind: input, shape index: {}]   ;;  %s215_s1 = inlined_call_operand.hbm [shape: f32[1,16,128], index: 1, kind: input, shape index: {}]   ;;  %s216_s2 = inlined_call_operand.hbm [shape: f32[2,16,128], index: 2, kind: output, shape index: {}]  }
   0x1   :  { %8 = vsyncpa [#allocation6], 0 }
   0x2   :  { %9 = vsyncpa [#allocation4], 0  ;;  %s149_s9 = smov [#allocation2]   ;;  %s77_s13 = scalar_lea.hbm %s214_s0, 512 }
   0x3   :  { %s15_s10 = sshll.u32 %s149_s9, 4  ;;  %p78_p0 = scmp.ne.s32.totalorder %s214_s0, %s77_s13  ;;  %s16_s10 = int_to_ptr.vmem [resolvable:$true] %s15_s10 }
   0x4   :  { %p81_p1 = scmp.lt.u32.totalorder %s77_s13, %s214_s0 }
   0x6   :  { %p83_p2 = pnand %p81_p1, %p78_p0 }
   0x8   :  { %86 = shalt.err (!%p83_p2)
}
   0x9   :  { %s87_s18 = scalar_lea.vmem %s16_s10, 512  ;;  %p92_p4 = scmp.lt.s32.totalorder %s16_s10, %s16_s10 }
   0xa   :  { %p88_p3 = scmp.ne.s32.totalorder %s16_s10, %s87_s18  ;;  %p93_p5 = scmp.lt.s32.totalorder %s87_s18, %s87_s18 }
   0xc   :  { %p94_p6 = por %p93_p5, %p92_p4 }
   0xe   :  { %p95_p7 = pnand %p94_p6, %p88_p3 }
  0x10   :  { %98 = shalt.err (!%p95_p7)
}
  0x11   :  { %s150_s19 = smov 128   ;;  %s151_s20 = smov 8  }
  0x12   :  { %21 = dma.hbm_to_vmem [thread:$0]  %s214_s0, 512, %s16_s10, [#allocation3], %s150_s19, %s150_s19, %s151_s20  }
  0x13   :  { %s152_s23 = smov [#allocation5]   ;;  %s99_s27 = scalar_lea.hbm %s215_s1, 256 }
  0x14   :  { %s27_s24 = sshll.u32 %s152_s23, 4  ;;  %p100_p8 = scmp.ne.s32.totalorder %s215_s1, %s99_s27  ;;  %s28_s24 = int_to_ptr.vmem [resolvable:$true] %s27_s24 }
  0x15   :  { %p103_p9 = scmp.lt.u32.totalorder %s99_s27, %s215_s1 }
  0x17   :  { %p105_p10 = pnand %p103_p9, %p100_p8 }
  0x19   :  { %108 = shalt.err (!%p105_p10)
}
  0x1a   :  { %s109_s4 = scalar_lea.vmem %s28_s24, 256  ;;  %p114_p12 = scmp.lt.s32.totalorder %s28_s24, %s28_s24 }
  0x1b   :  { %p110_p11 = scmp.ne.s32.totalorder %s28_s24, %s109_s4  ;;  %p115_p13 = scmp.lt.s32.totalorder %s109_s4, %s109_s4 }
  0x1d   :  { %p116_p0 = por %p115_p13, %p114_p12 }
  0x1f   :  { %p117_p1 = pnand %p116_p0, %p110_p11 }
  0x21   :  { %120 = shalt.err (!%p117_p1)
}
  0x22   :  { %33 = dma.hbm_to_vmem [thread:$0]  %s215_s1, 256, %s28_s24, [#allocation6], %s150_s19, %s150_s19, %s151_s20  }
  0x23   :  { %143 = dma.done.wait [#allocation3], 512  }
  0x24   :  { %144 = vsyncadd [#allocation3], 4294966784 }
  0x25   :  { %145 = dma.done.wait [#allocation6], 256  }
  0x26   :  { %146 = vsyncadd [#allocation6], 4294967040  ;;  %s153_s6 = smov [#allocation7]   ;;  %v40_v0 = vld [vmem:[#allocation2] sm:$0xff]  ;;  %v41_v2 = vld [vmem:[#allocation2 + $0x8] sm:$0xff] }
  0x27   :  { %s59_s7 = sshll.u32 %s153_s6, 4  ;;  %v44_v1 = vld [vmem:[#allocation5] sm:$0xff]  ;;  %v45_v4 = vld [vmem:[#allocation5 + $0x8] sm:$0xff]  ;;  %v42_v5 = vld [vmem:[#allocation2 + $0x10] sm:$0xff]  ;;  %s60_s7 = int_to_ptr.vmem [resolvable:$true] %s59_s7 }
  0x28   :  { %v46_v3 = vadd.f32 %v44_v1, %v40_v0  ;;  %v43_v6 = vld [vmem:[#allocation2 + $0x18] sm:$0xff]  ;;  %v47_v7 = vadd.f32 %v45_v4, %v41_v2  ;;  %v48_v8 = vadd.f32 %v44_v1, %v42_v5  ;;  %s121_s1 = scalar_lea.vmem %s60_s7, 512  ;;  %p126_p3 = scmp.lt.s32.totalorder %s60_s7, %s60_s7 }
  0x29   :  { %v49_v9 = vadd.f32 %v45_v4, %v43_v6  ;;  %p122_p2 = scmp.ne.s32.totalorder %s60_s7, %s121_s1  ;;  %p127_p4 = scmp.lt.s32.totalorder %s121_s1, %s121_s1 }
  0x2a   :  { %50 = vst [vmem:[#allocation7] sm:$0xff] %v46_v3  ;;  %51 = vst [vmem:[#allocation7 + $0x8] sm:$0xff] %v47_v7 }
  0x2b   :  { %52 = vst [vmem:[#allocation7 + $0x10] sm:$0xff] %v48_v8  ;;  %53 = vst [vmem:[#allocation7 + $0x18] sm:$0xff] %v49_v9  ;;  %p128_p5 = por %p127_p4, %p126_p3 }
  0x2d   :  { %p129_p6 = pnand %p128_p5, %p122_p2 }
  0x2f   :  { %132 = shalt.err (!%p129_p6)
}
  0x30   :  { %s133_s10 = scalar_lea.hbm %s216_s2, 512 }
  0x31   :  { %p134_p7 = scmp.ne.s32.totalorder %s216_s2, %s133_s10  ;;  %p137_p8 = scmp.lt.u32.totalorder %s133_s10, %s216_s2 }
  0x33   :  { %p139_p9 = pnand %p137_p8, %p134_p7 }
  0x35   :  { %142 = shalt.err (!%p139_p9)
}
  0x36   :  { %65 = dma.vmem_to_hbm [thread:$0]  %s60_s7, 512, %s216_s2, [#allocation4], %s150_s19, %s150_s19, %s151_s20  }
  0x37   :  { %147 = dma.done.wait [#allocation4], 512  }
  0x38   :  { %148 = vsyncadd [#allocation4], 4294966784 }
  0x39   :  { %69 = vsyncpa [#allocation3], 1 }
  0x3a   :  { %70 = vsyncpa [#allocation6], 1 }
  0x3b   :  { %71 = vsyncpa [#allocation4], 1 }

</bundles_post_ra>
